<compile_context>
chip_gen: v5e
topology: v5e:2x2
jax: 0.10.0
libtpu: 0.0.40
codegen_flags: <defaults>
</compile_context>

<pallas_src>
import math

import jax
import jax.numpy as jnp
from jax import lax
from jax.experimental import pallas as pl
from jax.experimental.pallas import tpu as pltpu


def _gru_summarizer_kernel(x_ref, w_ih_t_ref, w_hh_t_ref, b_ih_ref, b_hh_ref,
                           h_out_ref, gx_ref):
    """GRU over the full sequence; writes only the final hidden state.

    x_ref      : (T, D)   input representations (batch==1 squeezed away)
    w_ih_t_ref : (D, 3H)  transposed, gate-fused input weights   (r | z | n)
    w_hh_t_ref : (H, 3H)  transposed, gate-fused recurrent weights
    b_ih_ref   : (1, 3H)
    b_hh_ref   : (1, 3H)
    h_out_ref  : (1, H)   final hidden state
    gx_ref     : (T, 3H)  VMEM scratch: precomputed input-side gate pre-activations
    """
    H = h_out_ref.shape[-1]
    T = x_ref.shape[0]

    # (1) All input-side gate projections in a single wide MXU matmul
    #     (no recurrent dependency -> hoisted out of the serial loop).
    gx_ref[...] = (
        jnp.dot(x_ref[...], w_ih_t_ref[...], preferred_element_type=jnp.float32)
        + b_ih_ref[...]
    )

    # Hoist loop-invariant loads out of the time loop.
    w_hh_t = w_hh_t_ref[...]   # (H, 3H), VMEM/vreg resident across all steps
    b_hh = b_hh_ref[...]       # (1, 3H)

    def step(t, h):
        gx = gx_ref[pl.ds(t, 1), :]                                    # (1, 3H)
        # One fused recurrent matmul per step: (1, H) @ (H, 3H).
        gh = jnp.dot(h, w_hh_t, preferred_element_type=jnp.float32) + b_hh
        r = jax.nn.sigmoid(gx[:, 0:H] + gh[:, 0:H])
        z = jax.nn.sigmoid(gx[:, H:2 * H] + gh[:, H:2 * H])
        n = jnp.tanh(gx[:, 2 * H:3 * H] + r * gh[:, 2 * H:3 * H])
        return (1.0 - z) * n + z * h

    h0 = jnp.zeros((1, H), jnp.float32)
    h_final = lax.fori_loop(0, T, step, h0)
    h_out_ref[...] = h_final.astype(h_out_ref.dtype)


def rnn_summarizer_forward(representations, w_ih_t, w_hh_t, b_ih2, b_hh2):
    """Pallas GRU summarizer.

    representations : (T, D) float array
    w_ih_t          : (D, 3H)  (pre-transposed PyTorch weight_ih_l0)
    w_hh_t          : (H, 3H)  (pre-transposed PyTorch weight_hh_l0)
    b_ih2, b_hh2    : (1, 3H)
    returns         : (H,) final hidden state (== PyTorch h.squeeze())
    """
    T, D = representations.shape
    H = w_hh_t.shape[0]
    assert w_ih_t.shape == (D, 3 * H)

    x = representations.astype(jnp.float32)
    vmem = pl.BlockSpec(memory_space=pltpu.MemorySpace.VMEM)

    h_final = pl.pallas_call(
        _gru_summarizer_kernel,
        out_shape=jax.ShapeDtypeStruct((1, H), jnp.float32),
        in_specs=[vmem, vmem, vmem, vmem, vmem],
        out_specs=vmem,
        scratch_shapes=[pltpu.VMEM((T, 3 * H), jnp.float32)],
    )(x, w_ih_t, w_hh_t, b_ih2, b_hh2)

    return h_final[0]   # h.squeeze() -> (H,)


class RNNSummarizer:
    """JAX/Pallas mirror of the PyTorch RNNSummarizer (GRU, input_size == hidden)."""

    def __init__(self, input_size, activation=None, key=None):
        del activation  # unused by the PyTorch module's forward as well
        H = input_size
        if key is None:
            key = jax.random.PRNGKey(0)
        k1, k2, k3, k4 = jax.random.split(key, 4)
        bound = 1.0 / math.sqrt(H)
        init = lambda k, shape: jax.random.uniform(
            k, shape, jnp.float32, minval=-bound, maxval=bound)
        # PyTorch parameter layout: (3H, D) / (3H, H), gate order [r | z | n].
        self.w_ih = init(k1, (3 * H, H))
        self.w_hh = init(k2, (3 * H, H))
        self.b_ih = init(k3, (3 * H,))
        self.b_hh = init(k4, (3 * H,))
        self.hidden_size = H
        # Pre-transposed, gate-fused layouts for the kernel (done once at init,
        # not per call).
        self._w_ih_t = jnp.transpose(self.w_ih)          # (D, 3H)
        self._w_hh_t = jnp.transpose(self.w_hh)          # (H, 3H)
        self._b_ih2 = self.b_ih.reshape(1, 3 * H)
        self._b_hh2 = self.b_hh.reshape(1, 3 * H)

    def __call__(self, representations):
        return rnn_summarizer_forward(representations, self._w_ih_t,
                                      self._w_hh_t, self._b_ih2, self._b_hh2)


def gru_reference(x, w_ih, w_hh, b_ih, b_hh):
    """Pure-JAX reference matching torch.nn.GRU (1 layer, h0 = 0)."""
    T, _ = x.shape
    H = w_hh.shape[1]
    h = jnp.zeros((H,), jnp.float32)
    for t in range(T):
        gx = w_ih @ x[t] + b_ih
        gh = w_hh @ h + b_hh
        r = jax.nn.sigmoid(gx[0:H] + gh[0:H])
        z = jax.nn.sigmoid(gx[H:2 * H] + gh[H:2 * H])
        n = jnp.tanh(gx[2 * H:3 * H] + r * gh[2 * H:3 * H])
        h = (1.0 - z) * n + z * h
    return h


if __name__ == "__main__":
    key = jax.random.PRNGKey(0)
    seq_len, hidden = 8, 32          # input_size == hidden_size in RNNSummarizer
    k_x, k_p = jax.random.split(key)
    representations = jax.random.normal(k_x, (seq_len, hidden), dtype=jnp.float32)

    model = RNNSummarizer(hidden, activation=None, key=k_p)
    h = model(representations)
    h = jax.block_until_ready(h)

    h_ref = gru_reference(representations, model.w_ih, model.w_hh,
                          model.b_ih, model.b_hh)

    assert h.shape == (hidden,)
    assert bool(jnp.allclose(h, h_ref, atol=1e-4, rtol=1e-4)), "GRU forward mismatch"
    print("KERNEL_OK")
</pallas_src>

<mosaic_0001>
module attributes {stable_mosaic.version = 11 : i64} {
  func.func @_gru_summarizer_kernel(%arg0: memref<8x32xf32, #tpu.memory_space<vmem>>, %arg1: memref<32x96xf32, #tpu.memory_space<vmem>>, %arg2: memref<32x96xf32, #tpu.memory_space<vmem>>, %arg3: memref<1x96xf32, #tpu.memory_space<vmem>>, %arg4: memref<1x96xf32, #tpu.memory_space<vmem>>, %arg5: memref<1x32xf32, #tpu.memory_space<vmem>>, %arg6: memref<8x96xf32, #tpu.memory_space<vmem>>) attributes {dimension_semantics = [], scalar_prefetch = 0 : i64, scratch_operands = 1 : i64, tpu.core_type = #tpu.core_type<tc>} {
    %c0 = arith.constant 0 : index
    %c0_0 = arith.constant 0 : index
    %0 = vector.load %arg0[%c0, %c0_0] : memref<8x32xf32, #tpu.memory_space<vmem>>, vector<8x32xf32>
    %c0_1 = arith.constant 0 : index
    %c0_2 = arith.constant 0 : index
    %1 = vector.load %arg1[%c0_1, %c0_2] : memref<32x96xf32, #tpu.memory_space<vmem>>, vector<32x96xf32>
    %cst = arith.constant dense<0.000000e+00> : vector<8x96xf32>
    %2 = tpu.matmul %0, %1, %cst {dimension_numbers = #tpu.dot_dimension_numbers<[1], [0], [0], [1], [0, 0, 1, 1], [], []>} : vector<8x32xf32>, vector<32x96xf32>, vector<8x96xf32> -> vector<8x96xf32>
    %c0_3 = arith.constant 0 : index
    %c0_4 = arith.constant 0 : index
    %3 = vector.load %arg3[%c0_3, %c0_4] : memref<1x96xf32, #tpu.memory_space<vmem>>, vector<1x96xf32>
    %4 = vector.broadcast %3 : vector<1x96xf32> to vector<8x96xf32>
    %5 = arith.addf %2, %4 : vector<8x96xf32>
    %c0_5 = arith.constant 0 : index
    %c0_6 = arith.constant 0 : index
    %6 = vector.load %arg6[%c0_5, %c0_6] : memref<8x96xf32, #tpu.memory_space<vmem>>, vector<8x96xf32>
    tpu.vector_store %arg6[%c0_5, %c0_6], %5 {strides = array<i32>} : memref<8x96xf32, #tpu.memory_space<vmem>>, vector<8x96xf32>,
    %c0_7 = arith.constant 0 : index
    %c0_8 = arith.constant 0 : index
    %7 = vector.load %arg2[%c0_7, %c0_8] : memref<32x96xf32, #tpu.memory_space<vmem>>, vector<32x96xf32>
    %c0_9 = arith.constant 0 : index
    %c0_10 = arith.constant 0 : index
    %8 = vector.load %arg4[%c0_9, %c0_10] : memref<1x96xf32, #tpu.memory_space<vmem>>, vector<1x96xf32>
    %cst_11 = arith.constant 0.000000e+00 : f32
    %9 = vector.broadcast %cst_11 : f32 to vector<1x32xf32>
    %c0_i32 = arith.constant 0 : i32
    %c8_i32 = arith.constant 8 : i32
    %10 = arith.addi %c0_i32, %c8_i32 : i32
    %c1_i32 = arith.constant 1 : i32
    %11 = scf.for %arg7 = %c0_i32 to %10 step %c1_i32 iter_args(%arg8 = %9) -> (vector<1x32xf32>)  : i32 {
      %13 = arith.index_cast %arg7 : i32 to index
      %c0_15 = arith.constant 0 : index
      %14 = vector.load %arg6[%13, %c0_15] : memref<8x96xf32, #tpu.memory_space<vmem>>, vector<1x96xf32>
      %cst_16 = arith.constant dense<0.000000e+00> : vector<1x96xf32>
      %15 = tpu.matmul %arg8, %7, %cst_16 {dimension_numbers = #tpu.dot_dimension_numbers<[1], [0], [0], [1], [0, 0, 1, 1], [], []>} : vector<1x32xf32>, vector<32x96xf32>, vector<1x96xf32> -> vector<1x96xf32>
      %16 = arith.addf %15, %8 : vector<1x96xf32>
      %17 = vector.extract_strided_slice %14 {offsets = [0, 0], sizes = [1, 32], strides = [1, 1]} : vector<1x96xf32> to vector<1x32xf32>
      %18 = vector.extract_strided_slice %16 {offsets = [0, 0], sizes = [1, 32], strides = [1, 1]} : vector<1x96xf32> to vector<1x32xf32>
      %19 = arith.addf %17, %18 : vector<1x32xf32>
      %20 = arith.negf %19 : vector<1x32xf32>
      %21 = math.exp %20 : vector<1x32xf32>
      %cst_17 = arith.constant 1.000000e+00 : f32
      %22 = vector.broadcast %cst_17 : f32 to vector<1x32xf32>
      %23 = arith.addf %22, %21 : vector<1x32xf32>
      %24 = arith.divf %22, %23 : vector<1x32xf32>
      %25 = vector.extract_strided_slice %14 {offsets = [0, 32], sizes = [1, 32], strides = [1, 1]} : vector<1x96xf32> to vector<1x32xf32>
      %26 = vector.extract_strided_slice %16 {offsets = [0, 32], sizes = [1, 32], strides = [1, 1]} : vector<1x96xf32> to vector<1x32xf32>
      %27 = arith.addf %25, %26 : vector<1x32xf32>
      %28 = arith.negf %27 : vector<1x32xf32>
      %29 = math.exp %28 : vector<1x32xf32>
      %cst_18 = arith.constant 1.000000e+00 : f32
      %30 = vector.broadcast %cst_18 : f32 to vector<1x32xf32>
      %31 = arith.addf %30, %29 : vector<1x32xf32>
      %32 = arith.divf %30, %31 : vector<1x32xf32>
      %33 = vector.extract_strided_slice %14 {offsets = [0, 64], sizes = [1, 32], strides = [1, 1]} : vector<1x96xf32> to vector<1x32xf32>
      %34 = vector.extract_strided_slice %16 {offsets = [0, 64], sizes = [1, 32], strides = [1, 1]} : vector<1x96xf32> to vector<1x32xf32>
      %35 = arith.mulf %24, %34 : vector<1x32xf32>
      %36 = arith.addf %33, %35 : vector<1x32xf32>
      %37 = math.tanh %36 : vector<1x32xf32>
      %cst_19 = arith.constant 1.000000e+00 : f32
      %38 = vector.broadcast %cst_19 : f32 to vector<1x32xf32>
      %39 = arith.subf %38, %32 : vector<1x32xf32>
      %40 = arith.mulf %39, %37 : vector<1x32xf32>
      %41 = arith.mulf %32, %arg8 : vector<1x32xf32>
      %42 = arith.addf %40, %41 : vector<1x32xf32>
      scf.yield %42 : vector<1x32xf32>
    }
    %c8_i32_12 = arith.constant 8 : i32
    %c0_13 = arith.constant 0 : index
    %c0_14 = arith.constant 0 : index
    %12 = vector.load %arg5[%c0_13, %c0_14] : memref<1x32xf32, #tpu.memory_space<vmem>>, vector<1x32xf32>
    tpu.vector_store %arg5[%c0_13, %c0_14], %11 {strides = array<i32>} : memref<1x32xf32, #tpu.memory_space<vmem>>, vector<1x32xf32>,
    return
  }
}

</mosaic_0001>

<bundles_post_ra>
// kernel: tpu_custom_call.1
= control target key start
LH: loop header
LB: loop body
LE: loop exit
PB: predicated region body
PF: predicated region fallthrough
CT: control target
= control target key end

     0   :  { %10 = vsyncpa [#allocation4], 0  ;;  %s450_s0 = inlined_call_operand.hbm [shape: f32[8,32], index: 0, kind: input, shape index: {}]   ;;  %s451_s1 = inlined_call_operand.hbm [shape: f32[32,96], index: 1, kind: input, shape index: {}]   ;;  %s452_s2 = inlined_call_operand.hbm [shape: f32[32,96], index: 2, kind: input, shape index: {}]   ;;  %s453_s3 = inlined_call_operand.vmem [shape: f32[1,96], index: 3, kind: input, shape index: {}]   ;;  %s454_s4 = inlined_call_operand.vmem [shape: f32[1,96], index: 4, kind: input, shape index: {}]   ;;  %s455_s5 = inlined_call_operand.hbm [shape: f32[1,32], index: 5, kind: output, shape index: {}]  }
   0x1   :  { %11 = vsyncpa [#allocation7], 0  ;;  %s28_s20 = sshll.u32 %s451_s1, 4  ;;  %s29_s20 = int_to_ptr.hbm [resolvable:$true] %s28_s20 }
   0x2   :  { %12 = vsyncpa [#allocation5], 0  ;;  %s365_s21 = smov [#allocation6]   ;;  %s18_s25 = sshll.u32 %s450_s0, 4  ;;  %s19_s25 = int_to_ptr.hbm [resolvable:$true] %s18_s25 }
   0x3   :  { %s30_s22 = sshll.u32 %s365_s21, 4  ;;  %s366_s26 = smov 128   ;;  %s31_s22 = int_to_ptr.vmem [resolvable:$true] %s30_s22 }
   0x4   :  { %s367_s27 = smov 8   ;;  %s368_s28 = smov [#allocation3]  }
   0x5   :  { %36 = dma.hbm_to_vmem [thread:$0]  %s29_s20, 512, %s31_s22, [#allocation7], %s366_s26, %s366_s26, %s367_s27  }
   0x6   :  { %s20_s29 = sshll.u32 %s368_s28, 4  ;;  %s41_s7 = sshll.u32 %s452_s2, 4  ;;  %s21_s29 = int_to_ptr.vmem [resolvable:$true] %s20_s29  ;;  %s42_s7 = int_to_ptr.hbm [resolvable:$true] %s41_s7 }
   0x7   :  { %23 = dma.hbm_to_vmem [thread:$0]  %s19_s25, 128, %s21_s29, [#allocation4]  }
   0x8   :  { %s369_s1 = smov [#allocation8]  }
   0x9   :  { %s43_s8 = sshll.u32 %s369_s1, 4  ;;  %s44_s8 = int_to_ptr.vmem [resolvable:$true] %s43_s8 }
   0xa   :  { %49 = dma.hbm_to_vmem [thread:$0]  %s42_s7, 512, %s44_s8, [#allocation7], %s366_s26, %s366_s26, %s367_s27  }
   0xb   :  { %351 = dma.done.wait [#allocation4], 128  }
   0xc   :  { %352 = vsyncadd [#allocation4], 4294967168 }
   0xd   :  { %353 = dma.done.wait [#allocation7], 1024  }
   0xe   :  { %354 = vsyncadd [#allocation7], 4294966272  ;;  %v413_v0 = vld [vmem:[#allocation8] sm:$0xff]  ;;  %v415_v1 = vld [vmem:[#allocation8 + $0x8] sm:$0xff]  ;;  %vm75_vm0 = vcmask 261120   ;;  %vm99_vm1 = vcmask 785408  }
   0xf   :  { %v417_v2 = vld [vmem:[#allocation8 + $0x10] sm:$0xff]  ;;  %v419_v3 = vld [vmem:[#allocation8 + $0x18] sm:$0xff]  ;;  %v68_v7 = vld [vmem:[#allocation6 + $0x8] sm:$0xff]  ;;  %v357_v13 = vmov 0.0  }
  0x10   :  { %v424_v4 = vld [vmem:[%s454_s4] sm:$0x1]  ;;  %v70_v5 = vld [vmem:[#allocation6 + $0x18] sm:$0xff]  ;;  %v67_v8 = vld [vmem:[#allocation6] sm:$0xff]  ;;  %s430_s4 = smov 0  }
  0x11   :  { %91 = vmatpush.msra.mxu0 %v70_v5  ;;  %v69_v6 = vld [vmem:[#allocation6 + $0x10] sm:$0xff]  ;;  %v66_v9 = vld [vmem:[#allocation3] sm:$0xff] }
  0x12   :  { %v240_v10 = vld [vmem:[%s453_s3] ss:$0 sm:$0xff] }
  0x13   :  { %92 = vmatpush.msra.mxu0 %v69_v6 }
  0x15   :  { %93 = vmatpush.msra.mxu0 %v68_v7 }
  0x17   :  { %94 = vmatpush.msra.mxu0 %v67_v8 }
  0x18   :  { %212 = vmatmul.msk.f32.vlgmr.msra.gmra.mxu0 %vm75_vm0, %v66_v9 }
  0x95   :  { %v96_v11 = vpop.f32.mrf.mxu0 }
  0x96   :  { %v97_v12 = vadd.f32 %v240_v10, %v96_v11 }
  0x98   :  { %100 = vst.msk [vmem:[#allocation2] sm:$0xff] %vm99_vm1, %v97_v12 }
  0x99 LB: > { %132 = vmatpush.msra.mxu0 %v419_v3  ;;  %s370_s11 = smov 96   ;;  %s371_s3 = smov 64   ;;  %s363_s4 = sphi %s430_s4, %s111_s4   ;;  %v359_v13 = vphi %v357_v13, %v358_v13  }
  0x9a   : > { %116 = vrot.lane.b32.xlu0 %v359_v13, %s370_s11  ;;  %s113_s12 = scalar_lea.vmem [#allocation2], %s363_s4  ;;  %s111_s4 = sadd.s32 1, %s363_s4  }
  0x9b   : > { %133 = vmatpush.msra.mxu0 %v417_v2  ;;  %p108_p0 = scmp.ge.s32.totalorder %s111_s4, 8  }
  0x9c   :  { %s372_s13 = smov (%p108_p0), 96   ;;  %s373_s14 = smov (%p108_p0), [#allocation9]   ;;  %vm183_vm6 = vcmask (%p108_p0), 253952  }
  0x9d   : > { %134 = vmatpush.msra.mxu0 %v415_v1  ;;  %s190_s15 = sshll.u32 (%p108_p0), %s373_s14, 4  ;;  %s192_s18 = sshll.u32 (%p108_p0), %s455_s5, 4  ;;  %s191_s15 = int_to_ptr.vmem [resolvable:$true] %s190_s15  ;;  %s193_s18 = int_to_ptr.hbm [resolvable:$true] %s192_s18 }
  0x9f   : > { %135 = vmatpush.msra.mxu0 %v413_v0  ;;  %v114_v17 = vld [vmem:[%s113_s12] sm:$0x1] }
 0x10c   : > { %v117_v14 = vpop.permute.xlu0 %116 }
 0x10d   : > { %213 = vmatmul.msk.f32.vlgmr.msra.gmra.mxu0 %vm75_vm0, %v117_v14 }
 0x18a   : > { %v137_v15 = vpop.f32.mrf.mxu0 }
 0x18b   : > { %v138_v16 = vadd.f32 %v137_v15, %v424_v4 }
 0x18d   : > { %161 = vrot.lane.b32.xlu0 %v138_v16, %s371_s3  ;;  %v140_v18 = vadd.f32 %v138_v16, %v114_v17 }
 0x18f   : > { %v214_v19 = vmul.f32 -1.442695, %v140_v18 }
 0x191   : > { %241 = vpow2.f32 %v214_v19 }
 0x197   : > { %v242_v20 = vpop.eup %241 }
 0x198   : > { %v144_v21 = vadd.f32 1.0, %v242_v20 }
 0x19a   : > { %243 = vrcp.f32 %v144_v21  ;;  %v156_v27 = vand.u32 2147483648, %v144_v21  ;;  %vm150_vm3 = vweird.f32 %v144_v21  ;;  %v154_v28 = vand.u32 2147483647, %v144_v21 }
 0x19c   : > { %v157_v30 = vor.u32 1.1754944e-38, %v156_v27  ;;  %vm155_vm5 = vcmp.eq.f32.partialorder %v154_v28, 8.507059e+37 }
 0x1a0   : > { %v244_v22 = vpop.eup %243 }
 0x1a1   : > { %v146_v23 = vmul.f32 %v244_v22, %v144_v21  ;;  %vm151_vm2 = vweird.f32 %v244_v22 }
 0x1a2   : > { %vm152_vm4 = vmor %vm150_vm3, %vm151_vm2 }
 0x1a3   : > { %v147_v24 = vsub.f32 1.0, %v146_v23 }
 0x1a5   : > { %v148_v25 = vmul.f32 %v244_v22, %v147_v24 }
 0x1a7   : > { %v149_v26 = vadd.f32 %v244_v22, %v148_v25 }
 0x1a9   : > { %v153_v29 = vsel %vm152_vm4, %v244_v22, %v149_v26 }
 0x1aa   : > { %v158_v32 = vsel %vm155_vm5, %v157_v30, %v153_v29 }
 0x1ab   : > { %v171_v37 = vsub.f32 1.0, %v158_v32  ;;  %v177_v39 = vmul.f32 %v359_v13, %v158_v32 }
 0x1ff   : > { %v162_v31 = vpop.permute.xlu0 %161 }
 0x200   : > { %v164_v33 = vmul.f32 %v162_v31, %v158_v32 }
 0x202   : > { %166 = vrot.lane.b32.xlu1 %v164_v33, %s371_s3 }
 0x274   : > { %v167_v34 = vpop.permute.xlu1 %166 }
 0x275   : > { %v169_v35 = vadd.f32 %v167_v34, %v114_v17 }
 0x277   : > { %245 = vtanh.f32 %v169_v35 }
 0x27d   : > { %v246_v36 = vpop.eup %245 }
 0x27e   : > { %173 = vrot.lane.b32.xlu1 %v246_v36, %s370_s11 }
 0x2f0   : > { %v174_v38 = vpop.permute.xlu1 %173 }
 0x2f1   : > { %v176_v40 = vmul.f32 %v174_v38, %v171_v37  ;;  %110 = sbr.rel (!%p108_p0) target bundleno = 153 (0x99), region = 60 }
 0x2f3   : > { %v178_v41 = vadd.f32 %v177_v39, %v176_v40  }
 0x2f5   : > { %v358_v13 = vmov %v178_v41   ;;  %180 = vrot.lane.b32.xlu0 (%p108_p0), %v178_v41, %s372_s13 }
 0x367   :  { %v181_v42 = vpop.permute.xlu0 %180 }
 0x368   :  { %184 = vst.msk [vmem:[#allocation9] sm:$0x1] %vm183_vm6, %v181_v42 }
 0x369   :  { %195 = dma.vmem_to_hbm [thread:$0]  %s191_s15, 16, %s193_s18, [#allocation5]  }
 0x36a   :  { %355 = dma.done.wait [#allocation5], 16  }
 0x36b   :  { %356 = vsyncadd [#allocation5], 4294967280 }
 0x36c   :  { %200 = vsyncpa [#allocation4], 1 }
 0x36d   :  { %201 = vsyncpa [#allocation7], 1 }
 0x36e   :  { %202 = vsyncpa [#allocation5], 1 }

</bundles_post_ra>
